<compile_context>
chip_gen: v7x
topology: tpu7x:2x2x1
jax: 0.10.0
libtpu: 0.0.40
codegen_flags: <defaults>
</compile_context>

<pallas_src>
import functools

import jax
import jax.numpy as jnp
from jax import lax
from jax.experimental import pallas as pl
from jax.experimental.pallas import tpu as pltpu


def _round_up(v, m):
    return (v + m - 1) // m * m


def _vmem_budget_bytes():
    """Per-generation VMEM budget: ~3/4 of physical capacity.

    v5e/v6e have 128 MiB physical VMEM (-> ~96 MiB budget), v7x has 64 MiB
    (-> ~48 MiB).  Falls back conservatively if the query is unavailable.
    """
    cap = 64 * 1024 * 1024
    try:
        info = pltpu.get_tpu_info()
        cap = int(getattr(info, "vmem_capacity_bytes", cap) or cap)
    except Exception:
        pass
    return cap * 3 // 4


# --------------------------------------------------------------------------
# Fused small-graph kernel: everything resident in VMEM, single invocation.
# Inputs arrive already in bf16 (pre-cast in the wrapper).
# --------------------------------------------------------------------------
def _gcn_nc_fused_kernel(x_ref, adj_ref, w1_ref, w2_ref, apred_ref, z_ref):
    adj = adj_ref[...]                                    # bf16

    # Layer 1: relu(adj @ (x @ W1)) -- bf16 MXU operands, f32 accumulation.
    s1 = jnp.dot(x_ref[...], w1_ref[...], preferred_element_type=jnp.float32)
    h1 = jnp.maximum(
        jnp.dot(adj, s1.astype(jnp.bfloat16), preferred_element_type=jnp.float32),
        0.0)

    # Layer 2: relu(adj @ (h1 @ W2))
    s2 = jnp.dot(h1.astype(jnp.bfloat16), w2_ref[...],
                 preferred_element_type=jnp.float32)
    h2 = jnp.maximum(
        jnp.dot(adj, s2.astype(jnp.bfloat16), preferred_element_type=jnp.float32),
        0.0)

    # F.normalize(h2, p=2, dim=1): row / max(||row||, 1e-12) via EUP rsqrt.
    sq = jnp.sum(h2 * h2, axis=1, keepdims=True)
    z = h2 * lax.rsqrt(jnp.maximum(sq, 1e-24))

    # dot_product_decode: sigmoid(z @ z.T) contracting axis 1 of both sides.
    zb = z.astype(jnp.bfloat16)
    logits = lax.dot_general(zb, zb,
                             dimension_numbers=(((1,), (1,)), ((), ())),
                             preferred_element_type=jnp.float32)
    apred_ref[...] = jax.nn.sigmoid(logits).astype(apred_ref.dtype)
    z_ref[...] = z.astype(z_ref.dtype)


# --------------------------------------------------------------------------
# Row-tiled kernels for larger graphs (all streamed operands in bf16).
# --------------------------------------------------------------------------
def _linear_kernel(x_ref, w_ref, out_ref):
    # out_tile = x_tile @ W   (W resident across the row grid) -> bf16 out.
    out_ref[...] = jnp.dot(x_ref[...], w_ref[...],
                           preferred_element_type=jnp.float32
                           ).astype(out_ref.dtype)


def _propagate_kernel(adj_ref, support_ref, out_ref):
    # out_tile = relu(adj_rows @ support) -> bf16 (feeds the next matmul).
    h = jnp.dot(adj_ref[...], support_ref[...],
                preferred_element_type=jnp.float32)
    out_ref[...] = jnp.maximum(h, 0.0).astype(out_ref.dtype)


def _propagate_normalize_kernel(adj_ref, support_ref, z32_ref, zbf_ref):
    # Layer-2 propagate + row L2-normalize; emits z in f32 (returned value)
    # and bf16 (decoder input, avoids any per-band cast of the resident z).
    h = jnp.dot(adj_ref[...], support_ref[...],
                preferred_element_type=jnp.float32)
    h = jnp.maximum(h, 0.0)
    sq = jnp.sum(h * h, axis=1, keepdims=True)
    z = h * lax.rsqrt(jnp.maximum(sq, 1e-24))
    z32_ref[...] = z
    zbf_ref[...] = z.astype(zbf_ref.dtype)


def _decode_kernel(zrow_ref, zfull_ref, out_ref):
    # out_tile = sigmoid(z_rows @ z.T) without materializing z.T.
    logits = lax.dot_general(zrow_ref[...], zfull_ref[...],
                             dimension_numbers=(((1,), (1,)), ((), ())),
                             preferred_element_type=jnp.float32)
    out_ref[...] = jax.nn.sigmoid(logits).astype(out_ref.dtype)


def _gcn_layer_tiled(adj_b, x_b, w_b, *, row_block, normalize, vmem_bytes):
    """relu(adj @ (x @ W)) [opt. row-normalized], tiled over row bands.

    All inputs are bf16; W / support stay resident across the row grid
    (constant block index -> Pallas skips re-DMA after the first band).
    """
    n_pad = adj_b.shape[0]
    f_in = x_b.shape[1]
    f_out = w_b.shape[1]
    grid = (n_pad // row_block,)
    cp = pltpu.CompilerParams(dimension_semantics=("parallel",),
                              vmem_limit_bytes=vmem_bytes)

    # support = x @ W   (one pass over x; W resident) -> bf16.
    support = pl.pallas_call(
        _linear_kernel,
        out_shape=jax.ShapeDtypeStruct((n_pad, f_out), jnp.bfloat16),
        grid=grid,
        in_specs=[pl.BlockSpec((row_block, f_in), lambda i: (i, 0)),
                  pl.BlockSpec((f_in, f_out), lambda i: (0, 0))],
        out_specs=pl.BlockSpec((row_block, f_out), lambda i: (i, 0)),
        compiler_params=cp,
    )(x_b, w_b)

    if not normalize:
        # h = relu(adj @ support) -> bf16 (input to the next layer's linear).
        return pl.pallas_call(
            _propagate_kernel,
            out_shape=jax.ShapeDtypeStruct((n_pad, f_out), jnp.bfloat16),
            grid=grid,
            in_specs=[pl.BlockSpec((row_block, n_pad), lambda i: (i, 0)),
                      pl.BlockSpec((n_pad, f_out), lambda i: (0, 0))],
            out_specs=pl.BlockSpec((row_block, f_out), lambda i: (i, 0)),
            compiler_params=cp,
        )(adj_b, support)

    # Final layer: emit z in f32 (returned) and bf16 (decoder operand).
    return pl.pallas_call(
        _propagate_normalize_kernel,
        out_shape=(jax.ShapeDtypeStruct((n_pad, f_out), jnp.float32),
                   jax.ShapeDtypeStruct((n_pad, f_out), jnp.bfloat16)),
        grid=grid,
        in_specs=[pl.BlockSpec((row_block, n_pad), lambda i: (i, 0)),
                  pl.BlockSpec((n_pad, f_out), lambda i: (0, 0))],
        out_specs=(pl.BlockSpec((row_block, f_out), lambda i: (i, 0)),
                   pl.BlockSpec((row_block, f_out), lambda i: (i, 0))),
        compiler_params=cp,
    )(adj_b, support)


def _decode_tiled(z_b, *, row_block, vmem_bytes):
    n_pad, e_pad = z_b.shape
    grid = (n_pad // row_block,)
    return pl.pallas_call(
        _decode_kernel,
        out_shape=jax.ShapeDtypeStruct((n_pad, n_pad), jnp.float32),
        grid=grid,
        in_specs=[pl.BlockSpec((row_block, e_pad), lambda i: (i, 0)),
                  pl.BlockSpec((n_pad, e_pad), lambda i: (0, 0))],
        out_specs=pl.BlockSpec((row_block, n_pad), lambda i: (i, 0)),
        compiler_params=pltpu.CompilerParams(dimension_semantics=("parallel",),
                                             vmem_limit_bytes=vmem_bytes),
    )(z_b, z_b)


# --------------------------------------------------------------------------
# Sizing heuristics.
# --------------------------------------------------------------------------
def _fused_vmem_estimate(n, fp, hp, ep):
    """Rough fused-kernel VMEM footprint in bytes (inputs, outputs, temps)."""
    b = 2 * n * fp                   # x (bf16)
    b += 2 * n * n                   # adj (bf16)
    b += 2 * (fp * hp + hp * ep)     # W1, W2 (bf16)
    b += 4 * n * n                   # A_pred (f32 output)
    b += 4 * n * ep                  # z (f32 output)
    b += 6 * n * hp                  # s1/h1 f32 + h1 bf16
    b += 10 * n * ep                 # s2/h2/z f32 + z bf16
    b += 4 * n * n                   # logits (f32 temp)
    return int(b * 1.25)             # headroom for compiler temporaries


def _pick_row_block(requested, n128, f_out_max, budget):
    rb = min(requested, n128)
    if n128 >= 256:
        # Keep >= 2 row bands so dimension_semantics=("parallel",) can shard
        # across both v7x TensorCores (no-op on single-TC v5e/v6e).
        rb = min(rb, max(128, (n128 // 2) // 128 * 128))
    rb = max(rb, 128)

    def est(r):
        return (4 * r * n128            # adj band, bf16, double-buffered
                + 8 * r * n128          # A_pred band, f32, double-buffered
                + 4 * n128 * f_out_max  # resident support / z (bf16, 2 bufs)
                + 12 * r * f_out_max)   # small per-band in/out blocks

    while rb > 128 and est(rb) > budget:
        rb -= 128
    return rb


# --------------------------------------------------------------------------
# Public wrapper.
# --------------------------------------------------------------------------
@functools.partial(jax.jit, static_argnames=("fused_max_nodes", "row_block"))
def gcn_nc_forward(x, adj, w1, w2, *, fused_max_nodes=1024, row_block=None):
    N, F = x.shape
    H = w1.shape[1]
    E = w2.shape[1]
    assert adj.shape == (N, N)
    assert w1.shape == (F, H) and w2.shape == (H, E)

    # Lane-dense zero padding of the feature dims (exact: padded input columns
    # hit zero weight rows; padded hidden/embedding channels stay identically
    # zero through relu and do not change the row norm).
    Fp, Hp, Ep = (_round_up(d, 128) for d in (F, H, E))
    vmem_bytes = _vmem_budget_bytes()

    # bf16 MXU operands are prepared ONCE here: halves the dominant adj HBM
    # stream (read twice for the two propagation passes) and removes all
    # per-band casts of resident blocks inside the kernels.
    x_b = jnp.pad(x.astype(jnp.bfloat16), ((0, 0), (0, Fp - F)))
    w1_b = jnp.pad(w1.astype(jnp.bfloat16), ((0, Fp - F), (0, Hp - H)))
    w2_b = jnp.pad(w2.astype(jnp.bfloat16), ((0, Hp - H), (0, Ep - E)))
    adj_b = adj.astype(jnp.bfloat16)

    use_fused = (N <= fused_max_nodes and
                 _fused_vmem_estimate(N, Fp, Hp, Ep) <= vmem_bytes)

    if use_fused:
        # Monolithic path: no grid -> single-buffered whole-array VMEM refs.
        a_pred, z_p = pl.pallas_call(
            _gcn_nc_fused_kernel,
            out_shape=(jax.ShapeDtypeStruct((N, N), jnp.float32),    # A_pred
                       jax.ShapeDtypeStruct((N, Ep), jnp.float32)),  # z (padded E)
            in_specs=[pl.BlockSpec(memory_space=pltpu.MemorySpace.VMEM)] * 4,
            out_specs=(pl.BlockSpec(memory_space=pltpu.MemorySpace.VMEM),
                       pl.BlockSpec(memory_space=pltpu.MemorySpace.VMEM)),
            compiler_params=pltpu.CompilerParams(vmem_limit_bytes=vmem_bytes),
        )(x_b, adj_b, w1_b, w2_b)
        return a_pred, z_p[:, :E]

    # Row-tiled path for big graphs.  adj (bf16) is streamed once per
    # propagation pass; W / support / z stay VMEM-resident across the row grid
    # (constant block index -> no re-DMA after the first band).
    n128 = _round_up(N, 128)
    requested = (row_block if row_block is not None
                 else (512 if vmem_bytes >= 80 * 1024 * 1024 else 256))
    rb = _pick_row_block(requested, n128, max(Hp, Ep), vmem_bytes)
    n_pad = _round_up(N, rb)

    adj_p = jnp.pad(adj_b, ((0, n_pad - N), (0, n_pad - N)))
    x_p = jnp.pad(x_b, ((0, n_pad - N), (0, 0)))

    h1_b = _gcn_layer_tiled(adj_p, x_p, w1_b, row_block=rb,
                            normalize=False, vmem_bytes=vmem_bytes)
    z_f32, z_b = _gcn_layer_tiled(adj_p, h1_b, w2_b, row_block=rb,
                                  normalize=True, vmem_bytes=vmem_bytes)
    a_pred = _decode_tiled(z_b, row_block=rb, vmem_bytes=vmem_bytes)
    return a_pred[:N, :N], z_f32[:N, :E]


# --------------------------------------------------------------------------
# Pure-JAX f32 reference + test harness.
# --------------------------------------------------------------------------
def gcn_nc_reference(x, adj, w1, w2):
    h = jnp.maximum(adj @ (x @ w1), 0.0)
    h = jnp.maximum(adj @ (h @ w2), 0.0)
    norm = jnp.maximum(jnp.linalg.norm(h, axis=1, keepdims=True), 1e-12)
    z = h / norm
    a_pred = jax.nn.sigmoid(z @ z.T)
    return a_pred, z


def _xavier_uniform(key, shape, dtype=jnp.float32):
    fan_in, fan_out = shape
    limit = jnp.sqrt(6.0 / (fan_in + fan_out))
    return jax.random.uniform(key, shape, dtype=dtype, minval=-limit, maxval=limit)


def _make_inputs(key, n, f, h, e):
    kx, kadj, kw1, kw2 = jax.random.split(key, 4)
    x = jax.random.normal(kx, (n, f), dtype=jnp.float32)
    raw = (jax.random.uniform(kadj, (n, n)) > 0.7).astype(jnp.float32)
    adj = jnp.clip(raw + raw.T + jnp.eye(n, dtype=jnp.float32), 0.0, 1.0)
    adj = adj / jnp.sum(adj, axis=1, keepdims=True)
    w1 = _xavier_uniform(kw1, (f, h))
    w2 = _xavier_uniform(kw2, (h, e))
    return x, adj, w1, w2


if __name__ == "__main__":
    key = jax.random.PRNGKey(0)
    k_small, k_big = jax.random.split(key)

    # bf16 MXU operands -> compare against the f32 reference with loosened tol.
    ATOL = RTOL = 3e-2

    # Case 1: small module-consistent shapes -> fused single-VMEM-block path.
    N, F, H, E = 16, 32, 32, 16       # alpha=0.2 is stored but unused in forward
    x, adj, w1, w2 = _make_inputs(k_small, N, F, H, E)
    a_pred, z = gcn_nc_forward(x, adj, w1, w2)
    jax.block_until_ready((a_pred, z))
    a_ref, z_ref = gcn_nc_reference(x, adj, w1, w2)
    assert a_pred.shape == (N, N) and z.shape == (N, E)
    assert jnp.allclose(a_pred, a_ref, atol=ATOL, rtol=RTOL)
    assert jnp.allclose(z, z_ref, atol=ATOL, rtol=RTOL)

    # Case 2: larger graph -> exercise the row-tiled ("parallel" grid) path.
    N2, F2, H2, E2 = 256, 96, 64, 32
    x2, adj2, w12, w22 = _make_inputs(k_big, N2, F2, H2, E2)
    a_pred2, z2 = gcn_nc_forward(x2, adj2, w12, w22, fused_max_nodes=0)
    jax.block_until_ready((a_pred2, z2))
    a_ref2, z_ref2 = gcn_nc_reference(x2, adj2, w12, w22)
    assert a_pred2.shape == (N2, N2) and z2.shape == (N2, E2)
    assert jnp.allclose(a_pred2, a_ref2, atol=ATOL, rtol=RTOL)
    assert jnp.allclose(z2, z_ref2, atol=ATOL, rtol=RTOL)

    print("KERNEL_OK")
</pallas_src>

<mosaic_0001>
module attributes {stable_mosaic.version = 11 : i64} {
  func.func @_gcn_nc_fused_kernel(%arg0: memref<16x128xbf16, #tpu.memory_space<vmem>>, %arg1: memref<16x16xbf16, #tpu.memory_space<vmem>>, %arg2: memref<128x128xbf16, #tpu.memory_space<vmem>>, %arg3: memref<128x128xbf16, #tpu.memory_space<vmem>>, %arg4: memref<16x16xf32, #tpu.memory_space<vmem>>, %arg5: memref<16x128xf32, #tpu.memory_space<vmem>>) attributes {dimension_semantics = [], scalar_prefetch = 0 : i64, scratch_operands = 0 : i64, tpu.core_type = #tpu.core_type<tc>} {
    %c0 = arith.constant 0 : index
    %c0_0 = arith.constant 0 : index
    %0 = vector.load %arg1[%c0, %c0_0] : memref<16x16xbf16, #tpu.memory_space<vmem>>, vector<16x16xbf16>
    %c0_1 = arith.constant 0 : index
    %c0_2 = arith.constant 0 : index
    %1 = vector.load %arg0[%c0_1, %c0_2] : memref<16x128xbf16, #tpu.memory_space<vmem>>, vector<16x128xbf16>
    %c0_3 = arith.constant 0 : index
    %c0_4 = arith.constant 0 : index
    %2 = vector.load %arg2[%c0_3, %c0_4] : memref<128x128xbf16, #tpu.memory_space<vmem>>, vector<128x128xbf16>
    %cst = arith.constant dense<0.000000e+00> : vector<16x128xf32>
    %3 = tpu.matmul %1, %2, %cst {dimension_numbers = #tpu.dot_dimension_numbers<[1], [0], [0], [1], [0, 0, 1, 1], [], []>} : vector<16x128xbf16>, vector<128x128xbf16>, vector<16x128xf32> -> vector<16x128xf32>
    %4 = arith.truncf %3 : vector<16x128xf32> to vector<16x128xbf16>
    %cst_5 = arith.constant dense<0.000000e+00> : vector<16x128xf32>
    %5 = tpu.matmul %0, %4, %cst_5 {dimension_numbers = #tpu.dot_dimension_numbers<[1], [0], [0], [1], [0, 0, 1, 1], [], []>} : vector<16x16xbf16>, vector<16x128xbf16>, vector<16x128xf32> -> vector<16x128xf32>
    %cst_6 = arith.constant 0.000000e+00 : f32
    %6 = vector.broadcast %cst_6 : f32 to vector<16x128xf32>
    %7 = arith.maximumf %5, %6 : vector<16x128xf32>
    %8 = arith.truncf %7 : vector<16x128xf32> to vector<16x128xbf16>
    %c0_7 = arith.constant 0 : index
    %c0_8 = arith.constant 0 : index
    %9 = vector.load %arg3[%c0_7, %c0_8] : memref<128x128xbf16, #tpu.memory_space<vmem>>, vector<128x128xbf16>
    %cst_9 = arith.constant dense<0.000000e+00> : vector<16x128xf32>
    %10 = tpu.matmul %8, %9, %cst_9 {dimension_numbers = #tpu.dot_dimension_numbers<[1], [0], [0], [1], [0, 0, 1, 1], [], []>} : vector<16x128xbf16>, vector<128x128xbf16>, vector<16x128xf32> -> vector<16x128xf32>
    %11 = arith.truncf %10 : vector<16x128xf32> to vector<16x128xbf16>
    %cst_10 = arith.constant dense<0.000000e+00> : vector<16x128xf32>
    %12 = tpu.matmul %0, %11, %cst_10 {dimension_numbers = #tpu.dot_dimension_numbers<[1], [0], [0], [1], [0, 0, 1, 1], [], []>} : vector<16x16xbf16>, vector<16x128xbf16>, vector<16x128xf32> -> vector<16x128xf32>
    %cst_11 = arith.constant 0.000000e+00 : f32
    %13 = vector.broadcast %cst_11 : f32 to vector<16x128xf32>
    %14 = arith.maximumf %12, %13 : vector<16x128xf32>
    %15 = arith.mulf %14, %14 : vector<16x128xf32>
    %cst_12 = arith.constant dense<0.000000e+00> : vector<16xf32>
    %16 = vector.multi_reduction <add>, %15, %cst_12 [1] : vector<16x128xf32> to vector<16xf32>
    %17 = vector.shape_cast %16 : vector<16xf32> to vector<16x1xf32>
    %cst_13 = arith.constant 1.000000e-24 : f32
    %18 = vector.broadcast %cst_13 : f32 to vector<16x1xf32>
    %19 = arith.maximumf %17, %18 : vector<16x1xf32>
    %20 = math.rsqrt %19 : vector<16x1xf32>
    %21 = vector.broadcast %20 : vector<16x1xf32> to vector<16x128xf32>
    %22 = arith.mulf %14, %21 : vector<16x128xf32>
    %23 = arith.truncf %22 : vector<16x128xf32> to vector<16x128xbf16>
    %cst_14 = arith.constant dense<0.000000e+00> : vector<16x16xf32>
    %24 = tpu.matmul %23, %23, %cst_14 {dimension_numbers = #tpu.dot_dimension_numbers<[1], [1], [0], [0], [0, 0, 1, 0], [], []>} : vector<16x128xbf16>, vector<16x128xbf16>, vector<16x16xf32> -> vector<16x16xf32>
    %25 = arith.negf %24 : vector<16x16xf32>
    %26 = math.exp %25 : vector<16x16xf32>
    %cst_15 = arith.constant 1.000000e+00 : f32
    %27 = vector.broadcast %cst_15 : f32 to vector<16x16xf32>
    %28 = arith.addf %27, %26 : vector<16x16xf32>
    %29 = arith.divf %27, %28 : vector<16x16xf32>
    %c0_16 = arith.constant 0 : index
    %c0_17 = arith.constant 0 : index
    %30 = vector.load %arg4[%c0_16, %c0_17] : memref<16x16xf32, #tpu.memory_space<vmem>>, vector<16x16xf32>
    tpu.vector_store %arg4[%c0_16, %c0_17], %29 {strides = array<i32>} : memref<16x16xf32, #tpu.memory_space<vmem>>, vector<16x16xf32>,
    %c0_18 = arith.constant 0 : index
    %c0_19 = arith.constant 0 : index
    %31 = vector.load %arg5[%c0_18, %c0_19] : memref<16x128xf32, #tpu.memory_space<vmem>>, vector<16x128xf32>
    tpu.vector_store %arg5[%c0_18, %c0_19], %22 {strides = array<i32>} : memref<16x128xf32, #tpu.memory_space<vmem>>, vector<16x128xf32>,
    return
  }
}

</mosaic_0001>

<bundles_post_ra>
// kernel: gcn_nc_forward.1
= control target key start
LH: loop header
LB: loop body
LE: loop exit
PB: predicated region body
PF: predicated region fallthrough
CT: control target
= control target key end

     0   :  { %11 = vsyncpa [#allocation3], 0  ;;  %v630_v1 = vmov 0.0   ;;  %vm631_vm0 = vmmov 0   ;;  %s783_s0 = inlined_call_operand.vmem [shape: bf16[16,128], index: 0, kind: input, shape index: {}]   ;;  %s784_s1 = inlined_call_operand.vmem [shape: bf16[16,16], index: 1, kind: input, shape index: {}]   ;;  %s785_s2 = inlined_call_operand.vmem [shape: bf16[128,128], index: 2, kind: input, shape index: {}]   ;;  %s786_s3 = inlined_call_operand.vmem [shape: bf16[128,128], index: 3, kind: input, shape index: {}]   ;;  %s787_s4 = inlined_call_operand.hbm [shape: f32[16,16], index: 4, kind: output, shape index: {0}]   ;;  %s788_s5 = inlined_call_operand.hbm [shape: f32[16,128], index: 5, kind: output, shape index: {1}]  }
   0x1   :  { %v552_v0 = vld [vmem:[%s785_s2] sm:$0xff]   ;;  %488 = vmatprep.subr.bf16.mxu0 %v630_v1  ;;  %508 = vmatprep.subr.bf16.mxu1 %v630_v1  ;;  %v553_v2 = vld [vmem:[%s785_s2 + $0x8] sm:$0xff]   ;;  %v554_v3 = vld [vmem:[%s785_s2 + $0x10] sm:$0xff]  }
   0x2   :  { %489 = vmatpush3.bf16.msra.mxu0 %v552_v0  ;;  %504 = vmatprep.mubr.msk.bf16.mxu0 %vm631_vm0, %v630_v1  ;;  %v555_v4 = vld [vmem:[%s785_s2 + $0x18] sm:$0xff]   ;;  %v556_v5 = vld [vmem:[%s785_s2 + $0x20] sm:$0xff]  }
   0x3   :  { %490 = vmatprep.subr.bf16.mxu0 %v630_v1  ;;  %510 = vmatprep.mubr.msk.bf16.mxu1 %vm631_vm0, %v630_v1 }
   0x6   :  { %491 = vmatpush3.bf16.msra.mxu0 %v553_v2 }
   0x7   :  { %492 = vmatprep.subr.bf16.mxu0 %v630_v1 }
   0xa   :  { %493 = vmatpush3.bf16.msra.mxu0 %v554_v3 }
   0xb   :  { %494 = vmatprep.subr.bf16.mxu0 %v630_v1 }
   0xe   :  { %495 = vmatpush3.bf16.msra.mxu0 %v555_v4 }
   0xf   :  { %496 = vmatprep.subr.bf16.mxu0 %v630_v1 }
  0x10   :  { %12 = vsyncpa [#allocation5], 0  ;;  %v557_v6 = vld [vmem:[%s785_s2 + $0x28] sm:$0xff]   ;;  %v558_v7 = vld [vmem:[%s785_s2 + $0x30] sm:$0xff]   ;;  %vm143_vm1 = vcmask 130048  }
  0x11   :  { %v559_v8 = vld [vmem:[%s785_s2 + $0x38] sm:$0xff]   ;;  %v560_v9 = vld [vmem:[%s783_s0] sm:$0xff]   ;;  %v563_v17 = vld [vmem:[%s786_s3 + $0x8] sm:$0xff]  }
  0x12   :  { %497 = vmatpush3.bf16.msra.mxu0 %v556_v5  ;;  %v561_v15 = vld [vmem:[%s784_s1] sm:$0xff]   ;;  %v564_v18 = vld [vmem:[%s786_s3 + $0x10] sm:$0xff]   ;;  %v565_v19 = vld [vmem:[%s786_s3 + $0x18] sm:$0xff]  }
  0x13   :  { %498 = vmatprep.subr.bf16.mxu0 %v630_v1  ;;  %v562_v16 = vld [vmem:[%s786_s3] sm:$0xff]   ;;  %v567_v21 = vld [vmem:[%s786_s3 + $0x28] sm:$0xff]   ;;  %v568_v22 = vld [vmem:[%s786_s3 + $0x30] sm:$0xff]  }
  0x14   :  { %v566_v20 = vld [vmem:[%s786_s3 + $0x20] sm:$0xff]   ;;  %v569_v23 = vld [vmem:[%s786_s3 + $0x38] sm:$0xff]   ;;  %s632_s3 = smov [#allocation4]  }
  0x15   :  { %s427_s26 = sshll.u32 %s632_s3, 4  ;;  %s428_s26 = int_to_ptr.vmem [resolvable:$true] %s427_s26 }
  0x16   :  { %499 = vmatpush3.bf16.msra.mxu0 %v557_v6  ;;  %s582_s27 = scalar_lea.vmem %s428_s26, 256  ;;  %p587_p1 = scmp.lt.s32.totalorder %s428_s26, %s428_s26 }
  0x17   :  { %500 = vmatprep.subr.bf16.mxu0 %v630_v1  ;;  %p583_p0 = scmp.ne.s32.totalorder %s428_s26, %s582_s27  ;;  %p588_p2 = scmp.lt.s32.totalorder %s582_s27, %s582_s27 }
  0x19   :  { %p589_p3 = por %p588_p2, %p587_p1 }
  0x1a   :  { %501 = vmatpush3.bf16.msra.mxu0 %v558_v7 }
  0x1b   :  { %502 = vmatprep.subr.bf16.mxu0 %v630_v1  ;;  %p590_p4 = pnand %p589_p3, %p583_p0 }
  0x1e   :  { %503 = vmatpush3.bf16.msra.mxu0 %v559_v8 }
  0x1f   :  { %534 = vmatprep.subr.bf16.mxu0 %v630_v1 }
  0x21   :  { %505 = vmatmul.mubr.bf16.vlgmr.msra.gmra.mrb[0].mxu0 %v560_v9 }
  0x22   :  { %536 = vmatprep.mubr.msk.bf16.mxu0 %vm631_vm0, %v630_v1 }
  0xf4   :  { %v130_v10 = vpop.f32.mrb[0].mxu0 }
  0xf5   :  { %v506_v11 = vpop.f32.mrb[1].mxu0 }
  0xf6   :  { %v133_v12 = vpop.f32.mrb[2].mxu0 }
  0xf7   :  { %v137_v13 = vpack.c.bf16 %v133_v12, %v130_v10  ;;  %v507_v14 = vpop.f32.mrb[3].mxu0 }
  0xf9   :  { %509 = vmatpush3.bf16.msra.mxu1 %v137_v13 }
  0xfa   :  { %514 = vmatprep.subr.bf16.mxu1 %v630_v1 }
  0xfc   :  { %511 = vmatmul.mubr.msk.bf16.vlgmr.msra.gmra.mrb[0].mxu1 %vm143_vm1, %v561_v15 }
  0xfd   :  { %515 = vmatpush3.bf16.msra.mxu1 %v562_v16  ;;  %530 = vmatprep.mubr.msk.bf16.mxu1 %vm631_vm0, %v630_v1 }
  0xfe   :  { %516 = vmatprep.subr.bf16.mxu1 %v630_v1 }
 0x101   :  { %517 = vmatpush3.bf16.msra.mxu1 %v563_v17 }
 0x102   :  { %518 = vmatprep.subr.bf16.mxu1 %v630_v1 }
 0x105   :  { %519 = vmatpush3.bf16.msra.mxu1 %v564_v18 }
 0x106   :  { %520 = vmatprep.subr.bf16.mxu1 %v630_v1 }
 0x109   :  { %521 = vmatpush3.bf16.msra.mxu1 %v565_v19 }
 0x10a   :  { %522 = vmatprep.subr.bf16.mxu1 %v630_v1 }
 0x10d   :  { %523 = vmatpush3.bf16.msra.mxu1 %v566_v20 }
 0x10e   :  { %524 = vmatprep.subr.bf16.mxu1 %v630_v1 }
 0x111   :  { %525 = vmatpush3.bf16.msra.mxu1 %v567_v21 }
 0x112   :  { %526 = vmatprep.subr.bf16.mxu1 %v630_v1 }
 0x115   :  { %527 = vmatpush3.bf16.msra.mxu1 %v568_v22 }
 0x116   :  { %528 = vmatprep.subr.bf16.mxu1 %v630_v1 }
 0x119   :  { %529 = vmatpush3.bf16.msra.mxu1 %v569_v23 }
 0x11a   :  { %540 = vmatprep.subr.bf16.mxu1 %v630_v1 }
 0x1cf   :  { %v181_v24 = vpop.f32.mrb[0].mxu1 }
 0x1d0   :  { %v512_v25 = vpop.f32.mrb[1].mxu1  ;;  %v188_v27 = vmax.f32 %v181_v24, 0.0 }
 0x1d1   :  { %v184_v26 = vpop.f32.mrb[2].mxu1 }
 0x1d2   :  { %v189_v28 = vmax.f32 %v184_v26, 0.0  ;;  %v513_v29 = vpop.f32.mrb[3].mxu1 }
 0x1d4   :  { %v190_v30 = vpack.c.bf16 %v189_v28, %v188_v27 }
 0x1d6   :  { %531 = vmatmul.mubr.bf16.vlgmr.msra.gmra.mrb[4].mxu1 %v190_v30 }
 0x1d7   :  { %542 = vmatprep.mubr.msk.bf16.mxu1 %vm631_vm0, %v630_v1 }
 0x2a9   :  { %v289_v31 = vpop.f32.mrb[4].mxu1 }
 0x2aa   :  { %v532_v32 = vpop.f32.mrb[5].mxu1 }
 0x2ab   :  { %v292_v33 = vpop.f32.mrb[6].mxu1 }
 0x2ac   :  { %v296_v34 = vpack.c.bf16 %v292_v33, %v289_v31  ;;  %v533_v35 = vpop.f32.mrb[7].mxu1 }
 0x2ae   :  { %535 = vmatpush3.bf16.msra.mxu0 %v296_v34 }
 0x2b1   :  { %537 = vmatmul.mubr.msk.bf16.vlgmr.msra.gmra.mrb[4].mxu0 %vm143_vm1, %v561_v15 }
 0x384   :  { %v331_v36 = vpop.f32.mrb[4].mxu0 }
 0x385   :  { %v338_v37 = vmax.f32 %v331_v36, 0.0  ;;  %v538_v38 = vpop.f32.mrb[5].mxu0 }
 0x386   :  { %v334_v39 = vpop.f32.mrb[6].mxu0 }
 0x387   :  { %v339_v40 = vmax.f32 %v334_v39, 0.0  ;;  %v539_v41 = vpop.f32.mrb[7].mxu0  ;;  %v340_v42 = vmul.f32 %v338_v37, %v338_v37 }
 0x389   :  { %342 = vadd.xlane.f32.xlu0 %v340_v42  ;;  %v341_v43 = vmul.f32 %v339_v40, %v339_v40 }
 0x38d   :  { %344 = vadd.xlane.f32.xlu0 %v341_v43 }
 0x416   :  { %v343_v44 = vpop.xlane.xlu0 %342 }
 0x417   :  { %v346_v45 = vmax.f32 %v343_v44, 1e-24 }
 0x419   :  { %570 = vrsqrt.f32 %v346_v45 }
 0x41a   :  { %v345_v46 = vpop.xlane.xlu0 %344 }
 0x41b   :  { %v347_v47 = vmax.f32 %v345_v46, 1e-24 }
 0x41d   :  { %572 = vrsqrt.f32 %v347_v47 }
 0x423   :  { %v571_v48 = vpop.eup %570 }
 0x424   :  { %v350_v49 = vmul.f32 %v571_v48, %v338_v37 }
 0x426   :  { %408 = vst [vmem:[#allocation4] sm:$0xff] %v350_v49 }
 0x427   :  { %v573_v50 = vpop.eup %572 }
 0x428   :  { %v351_v51 = vmul.f32 %v573_v50, %v339_v40 }
 0x42a   :  { %v352_v52 = vpack.c.bf16 %v351_v51, %v350_v49  ;;  %409 = vst [vmem:[#allocation4 + $0x8] sm:$0xff] %v351_v51 }
 0x42c   :  { %541 = vmatpush3.bf16.xpose.msra.mxu1 %v352_v52 }
 0x433   :  { %543 = vmatmul.mubr.bf16.vlgmr.msra.gmra.mrb[8].mxu1 %v352_v52 }
 0x434   :  { %593 = shalt.err (!%p590_p4)
}
 0x435   :  { %s594_s30 = scalar_lea.hbm %s788_s5, 256 }
 0x436   :  { %p595_p5 = scmp.ne.s32.totalorder %s788_s5, %s594_s30  ;;  %p598_p6 = scmp.lt.u32.totalorder %s594_s30, %s788_s5 }
 0x438   :  { %p600_p7 = pnand %p598_p6, %p595_p5 }
 0x43a   :  { %603 = shalt.err (!%p600_p7)
}
 0x43b   :  { %s633_s10 = smov 128   ;;  %s634_s11 = smov 8  }
 0x43c   :  { %433 = dma.vmem_to_hbm [thread:$0]  %s428_s26, 256, %s788_s5, [#allocation5], %s633_s10, %s633_s10, %s634_s11  }
 0x43d   :  { %s635_s0 = smov [#allocation2]  }
 0x43e   :  { %s415_s13 = sshll.u32 %s635_s0, 4  ;;  %s416_s13 = int_to_ptr.vmem [resolvable:$true] %s415_s13 }
 0x43f   :  { %s604_s5 = scalar_lea.vmem %s416_s13, 256  ;;  %p609_p9 = scmp.lt.s32.totalorder %s416_s13, %s416_s13 }
 0x440   :  { %p605_p8 = scmp.ne.s32.totalorder %s416_s13, %s604_s5  ;;  %p610_p10 = scmp.lt.s32.totalorder %s604_s5, %s604_s5 }
 0x442   :  { %p611_p11 = por %p610_p10, %p609_p9 }
 0x444   :  { %p612_p12 = pnand %p611_p11, %p605_p8 }
 0x506   :  { %v387_v53 = vpop.f32.mrb[8].mxu1 }
 0x507   :  { %v462_v54 = vmul.f32 -1.442695, %v387_v53  ;;  %v544_v55 = vpop.f32.mrb[9].mxu1 }
 0x508   :  { %v390_v56 = vpop.f32.mrb[10].mxu1 }
 0x509   :  { %574 = vpow2.f32 %v462_v54  ;;  %v463_v57 = vmul.f32 -1.442695, %v390_v56  ;;  %v545_v58 = vpop.f32.mrb[11].mxu1 }
 0x50b   :  { %576 = vpow2.f32 %v463_v57 }
 0x513   :  { %v575_v59 = vpop.eup %574 }
 0x514   :  { %v400_v60 = vadd.f32 1.0, %v575_v59 }
 0x515   :  { %v577_v61 = vpop.eup %576 }
 0x516   :  { %578 = vrcp.f32 %v400_v60  ;;  %v401_v62 = vadd.f32 1.0, %v577_v61 }
 0x518   :  { %580 = vrcp.f32 %v401_v62 }
 0x520   :  { %v579_v63 = vpop.eup %578 }
 0x521   :  { %406 = vst.msk [vmem:[#allocation2] sm:$0xff] %vm143_vm1, %v579_v63 }
 0x522   :  { %v581_v0 = vpop.eup %580 }
 0x523   :  { %407 = vst.msk [vmem:[#allocation2 + $0x8] sm:$0xff] %vm143_vm1, %v581_v0 }
 0x524   :  { %615 = shalt.err (!%p612_p12)
}
 0x525   :  { %s616_s15 = scalar_lea.hbm %s787_s4, 256 }
 0x526   :  { %p617_p13 = scmp.ne.s32.totalorder %s787_s4, %s616_s15  ;;  %p620_p0 = scmp.lt.u32.totalorder %s616_s15, %s787_s4 }
 0x528   :  { %p622_p1 = pnand %p620_p0, %p617_p13 }
 0x52a   :  { %625 = shalt.err (!%p622_p1)
}
 0x52b   :  { %421 = dma.vmem_to_hbm [thread:$0]  %s416_s13, 256, %s787_s4, [#allocation3], %s633_s10, %s633_s10, %s634_s11  }
 0x52c   :  { %626 = dma.done.wait [#allocation3], 256  }
 0x52d   :  { %627 = vsyncadd [#allocation3], 4294967040 }
 0x52e   :  { %628 = dma.done.wait [#allocation5], 256  }
 0x52f   :  { %629 = vsyncadd [#allocation5], 4294967040 }
 0x530   :  { %440 = vsyncpa [#allocation3], 1 }
 0x531   :  { %441 = vsyncpa [#allocation5], 1 }

</bundles_post_ra>
